<compile_context>
chip_gen: v5e
topology: v5e:2x2
jax: 0.10.0
libtpu: 0.0.40
codegen_flags: <defaults>
</compile_context>

<pallas_src>
import jax
import jax.numpy as jnp
from jax.experimental import pallas as pl
from jax.experimental.pallas import tpu as pltpu

EPS = 1e-5
_LANE = 128
_MIB = 1 << 20


def _round_up(v, m):
    return ((v + m - 1) // m) * m


def _cdiv(a, b):
    return -(-a // b)


def _pad2d(a, rows, cols):
    return jnp.pad(a, ((0, rows - a.shape[0]), (0, cols - a.shape[1])))


def _pad1d(a, n):
    return jnp.pad(a, (0, n - a.shape[0]))


# ---------------- generation-aware VMEM budget & tiling -----------------------

_VMEM_LIMIT_CACHE = None


def _vmem_limit_bytes():
    """Scoped-VMEM request per generation, leaving headroom for scratch/sems."""
    global _VMEM_LIMIT_CACHE
    if _VMEM_LIMIT_CACHE is not None:
        return _VMEM_LIMIT_CACHE
    limit = None
    try:
        phys = int(pltpu.get_tpu_info().vmem_capacity_bytes)
        limit = max(32 * _MIB, min(phys - 16 * _MIB, 112 * _MIB))
    except Exception:
        limit = None
    if limit is None:
        kind = ""
        try:
            kind = jax.devices()[0].device_kind.lower()
        except Exception:
            pass
        if "v7" in kind:
            limit = 48 * _MIB            # v7x: 64 MiB physical per TensorCore
        elif ("v6" in kind) or ("v5" in kind):
            limit = 112 * _MIB           # v5e/v5p/v6e: 128 MiB physical
        else:
            limit = 64 * _MIB            # conservative known-good default
    _VMEM_LIMIT_CACHE = limit
    return limit


def _mosaic_params():
    return pltpu.CompilerParams(
        dimension_semantics=("parallel",),     # M-tiles are independent
        vmem_limit_bytes=int(_vmem_limit_bytes()),
    )


def _cost(flops, bytes_accessed):
    return pl.CostEstimate(flops=int(flops), transcendentals=0,
                           bytes_accessed=int(bytes_accessed))


def _default_tm(M, kp, cp):
    """Largest conv-pass M-tile whose double-buffered footprint fits VMEM."""
    vmem_limit = _vmem_limit_bytes()
    tm = 1024 if vmem_limit >= 96 * _MIB else 512
    budget = int(0.6 * vmem_limit)

    def footprint(t):
        # 2x bf16 patch tile + 2x bf16 y tile + (double-buffered) bf16 weights
        # + per-tile stats.
        return 2 * t * kp * 2 + 2 * t * cp * 2 + 2 * kp * cp * 2 + 8 * 8 * cp * 4

    while tm > 128 and footprint(tm) > budget:
        tm //= 2
    tm = min(tm, _round_up(M, 16))
    return max(16, _round_up(tm, 16))


# ----------------------------- Pallas kernels ---------------------------------

def conv_stats_kernel(p_ref, w_ref, y_ref, s_ref, q_ref):
    """One M-tile of conv-as-matmul + per-tile BN partial statistics.

    y = p @ w   (bf16 x bf16 -> f32 MXU accumulation; stored as y_ref.dtype)
    s/q = per-channel partial sum / sum-of-squares of the f32 accumulator,
    collapsed to 8 sublanes (VPU adds); the cross-sublane / cross-tile collapse
    is deferred to tiny XLA glue.
    """
    y = jnp.dot(p_ref[...], w_ref[...], preferred_element_type=jnp.float32)
    y_ref[...] = y.astype(y_ref.dtype)
    tm, cp = y.shape
    yg = y.reshape(tm // 8, 8, cp)           # sublane-group aligned, no shuffle
    s_ref[...] = jnp.sum(yg, axis=0)
    q_ref[...] = jnp.sum(yg * yg, axis=0)


def conv_stats_proj_kernel(p_ref, w_ref, xs_ref, ws_ref,
                           y_ref, s_ref, q_ref, ss_ref, qs_ref):
    """conv2 tile + fused projection-shortcut statistics (ysc never hits HBM)."""
    y = jnp.dot(p_ref[...], w_ref[...], preferred_element_type=jnp.float32)
    y_ref[...] = y.astype(y_ref.dtype)
    tm, cp = y.shape
    yg = y.reshape(tm // 8, 8, cp)
    s_ref[...] = jnp.sum(yg, axis=0)
    q_ref[...] = jnp.sum(yg * yg, axis=0)
    ysc = jnp.dot(xs_ref[...], ws_ref[...], preferred_element_type=jnp.float32)
    sg = ysc.reshape(tm // 8, 8, cp)
    ss_ref[...] = jnp.sum(sg, axis=0)
    qs_ref[...] = jnp.sum(sg * sg, axis=0)


def bn_add_relu_identity_kernel(y_ref, x_ref, s2_ref, t2_ref, o_ref):
    """Epilogue (identity shortcut): relu(bn2(y2) + x)  (f32 VPU math)."""
    y = y_ref[...].astype(jnp.float32) * s2_ref[...] + t2_ref[...]
    o_ref[...] = jnp.maximum(y + x_ref[...].astype(jnp.float32), 0.0)


def bn_add_relu_proj_kernel(y_ref, xs_ref, ws_ref, s2_ref, t2_ref,
                            ss_ref, ts_ref, o_ref):
    """Epilogue (projection): recompute 1x1 matmul, relu(bn2(y2)+bn_s(xs@ws))."""
    y = y_ref[...].astype(jnp.float32) * s2_ref[...] + t2_ref[...]
    sc = jnp.dot(xs_ref[...], ws_ref[...], preferred_element_type=jnp.float32)
    sc = sc * ss_ref[...] + ts_ref[...]
    o_ref[...] = jnp.maximum(y + sc, 0.0)


# ------------------------------ Pallas wrappers --------------------------------

def _conv_stats(patches, weights, tm):
    """Tiled (Mp, Kp) @ (Kp, Cp) matmul -> bf16 y + per-tile BN partials."""
    mp, kp = patches.shape
    cp = weights.shape[1]
    nt = mp // tm
    flops = 2 * mp * kp * cp + 3 * mp * cp
    nbytes = mp * kp * 2 + kp * cp * 2 + mp * cp * 2 + 2 * nt * 8 * cp * 4
    return pl.pallas_call(
        conv_stats_kernel,
        grid=(nt,),
        in_specs=[
            pl.BlockSpec((tm, kp), lambda i: (i, 0)),
            pl.BlockSpec((kp, cp), lambda i: (0, 0)),   # weights stay resident
        ],
        out_specs=(
            pl.BlockSpec((tm, cp), lambda i: (i, 0)),
            pl.BlockSpec((8, cp), lambda i: (i, 0)),
            pl.BlockSpec((8, cp), lambda i: (i, 0)),
        ),
        out_shape=(
            jax.ShapeDtypeStruct((mp, cp), jnp.bfloat16),
            jax.ShapeDtypeStruct((nt * 8, cp), jnp.float32),
            jax.ShapeDtypeStruct((nt * 8, cp), jnp.float32),
        ),
        compiler_params=_mosaic_params(),
        cost_estimate=_cost(flops, nbytes),
    )(patches, weights)


def _conv_stats_proj(patches, weights, xs, ws, tm):
    """conv2 matmul + stats with fused projection-shortcut stats (no ysc out)."""
    mp, kp = patches.shape
    cp = weights.shape[1]
    cin_p = xs.shape[1]
    nt = mp // tm
    flops = 2 * mp * (kp + cin_p) * cp + 6 * mp * cp
    nbytes = (mp * (kp + cin_p) * 2 + (kp + cin_p) * cp * 2 + mp * cp * 2
              + 4 * nt * 8 * cp * 4)
    return pl.pallas_call(
        conv_stats_proj_kernel,
        grid=(nt,),
        in_specs=[
            pl.BlockSpec((tm, kp), lambda i: (i, 0)),
            pl.BlockSpec((kp, cp), lambda i: (0, 0)),        # resident weights
            pl.BlockSpec((tm, cin_p), lambda i: (i, 0)),
            pl.BlockSpec((cin_p, cp), lambda i: (0, 0)),     # resident weights
        ],
        out_specs=(
            pl.BlockSpec((tm, cp), lambda i: (i, 0)),
            pl.BlockSpec((8, cp), lambda i: (i, 0)),
            pl.BlockSpec((8, cp), lambda i: (i, 0)),
            pl.BlockSpec((8, cp), lambda i: (i, 0)),
            pl.BlockSpec((8, cp), lambda i: (i, 0)),
        ),
        out_shape=(
            jax.ShapeDtypeStruct((mp, cp), jnp.bfloat16),
            jax.ShapeDtypeStruct((nt * 8, cp), jnp.float32),
            jax.ShapeDtypeStruct((nt * 8, cp), jnp.float32),
            jax.ShapeDtypeStruct((nt * 8, cp), jnp.float32),
            jax.ShapeDtypeStruct((nt * 8, cp), jnp.float32),
        ),
        compiler_params=_mosaic_params(),
        cost_estimate=_cost(flops, nbytes),
    )(patches, weights, xs, ws)


def _bn_add_relu_identity(y2, xid, scale2, shift2, tm):
    mp, cp = y2.shape
    nt = mp // tm
    row = pl.BlockSpec((tm, cp), lambda i: (i, 0))
    vec = pl.BlockSpec((1, cp), lambda i: (0, 0))
    nbytes = 2 * mp * cp * 2 + mp * cp * 4 + 2 * cp * 4
    return pl.pallas_call(
        bn_add_relu_identity_kernel,
        grid=(nt,),
        in_specs=[row, row, vec, vec],
        out_specs=row,
        out_shape=jax.ShapeDtypeStruct((mp, cp), jnp.float32),
        compiler_params=_mosaic_params(),
        cost_estimate=_cost(4 * mp * cp, nbytes),
    )(y2, xid, scale2, shift2)


def _bn_add_relu_proj(y2, xs, ws, scale2, shift2, scale_s, shift_s, tm):
    mp, cp = y2.shape
    cin_p = xs.shape[1]
    nt = mp // tm
    row_y = pl.BlockSpec((tm, cp), lambda i: (i, 0))
    row_x = pl.BlockSpec((tm, cin_p), lambda i: (i, 0))
    wspec = pl.BlockSpec((cin_p, cp), lambda i: (0, 0))      # resident weights
    vec = pl.BlockSpec((1, cp), lambda i: (0, 0))
    flops = 2 * mp * cin_p * cp + 6 * mp * cp
    nbytes = (mp * cp * 2 + mp * cin_p * 2 + cin_p * cp * 2
              + mp * cp * 4 + 4 * cp * 4)
    return pl.pallas_call(
        bn_add_relu_proj_kernel,
        grid=(nt,),
        in_specs=[row_y, row_x, wspec, vec, vec, vec, vec],
        out_specs=row_y,
        out_shape=jax.ShapeDtypeStruct((mp, cp), jnp.float32),
        compiler_params=_mosaic_params(),
        cost_estimate=_cost(flops, nbytes),
    )(y2, xs, ws, scale2, shift2, scale_s, shift_s)


# --------------------------------- JAX glue ------------------------------------

def _finalize_stats(psum, psq, m, gamma_p, beta_p):
    """Per-tile partials -> per-channel BN scale/shift (tiny, runs in XLA).

    NOTE: E[x^2]-E[x]^2 in f32 with a >=0 clamp; a mean-shifted / Welford merge
    would be safer for very large M if this ever feeds training.
    """
    s = jnp.sum(psum, axis=0)
    q = jnp.sum(psq, axis=0)
    mean = s / m                                   # zero-padded rows add 0
    var = jnp.maximum(q / m - mean * mean, 0.0)    # clamp f32 cancellation
    inv = jax.lax.rsqrt(var + EPS)
    scale = gamma_p * inv
    shift = beta_p - mean * scale
    return scale.reshape(1, -1), shift.reshape(1, -1)


def _im2col(x, ksize, stride, padding):
    """x: (N,H,W,C) -> patches (N*Ho*Wo, ksize*ksize*C), plus (Ho, Wo)."""
    N, H, W, C = x.shape
    xp = jnp.pad(x, ((0, 0), (padding, padding), (padding, padding), (0, 0)))
    Ho = (H + 2 * padding - ksize) // stride + 1
    Wo = (W + 2 * padding - ksize) // stride + 1
    cols = []
    for ky in range(ksize):
        for kx in range(ksize):
            cols.append(xp[:, ky:ky + stride * Ho:stride,
                           kx:kx + stride * Wo:stride, :])
    patches = jnp.concatenate(cols, axis=-1)       # (N, Ho, Wo, k*k*C)
    return patches.reshape(N * Ho * Wo, ksize * ksize * C), (Ho, Wo)


def basic_block_forward(x, params, stride, tm=None):
    """Pallas BasicBlock.forward. x: (N, H, W, Cin) float32 (NHWC)."""
    N, H, W, Cin = x.shape
    w1, g1, b1 = params["w1"], params["g1"], params["b1"]
    w2, g2, b2 = params["w2"], params["g2"], params["b2"]
    Cout = w1.shape[-1]

    # conv1 patches (XLA glue; see TODO(synk) in the header)
    p1, (Ho, Wo) = _im2col(x, 3, stride, 1)
    M = N * Ho * Wo

    # Geometry: lane-dense channel / K padding, generation-aware tile sizes.
    Cp = _round_up(Cout, _LANE)
    Cin_p = _round_up(Cin, _LANE)
    K1p = _round_up(9 * Cin, _LANE)
    K2p = _round_up(9 * Cout, _LANE)

    if tm is None:
        tm = _default_tm(M, max(K1p, K2p), Cp)
    tm = max(16, _round_up(tm, 16))            # tm % 8 == 0 for the stats reshape

    vmem_limit = _vmem_limit_bytes()
    epi_rows = 2048 if vmem_limit >= 96 * _MIB else 1024
    k_epi = max(1, min(epi_rows // tm, _cdiv(M, tm)))
    tm_epi = k_epi * tm                         # epilogue tile, multiple of tm
    Mp = _round_up(M, tm_epi)                   # zero rows contribute 0 to sums

    g1p, b1p = _pad1d(g1, Cp), _pad1d(b1, Cp)
    g2p, b2p = _pad1d(g2, Cp), _pad1d(b2, Cp)

    # ---- conv1 (tiled matmul + stats) -> BN1 scale/shift ----
    p1 = _pad2d(p1, Mp, K1p).astype(jnp.bfloat16)
    w1m = _pad2d(w1.reshape(9 * Cin, Cout), K1p, Cp).astype(jnp.bfloat16)
    y1, s1, q1 = _conv_stats(p1, w1m, tm)
    scale1, shift1 = _finalize_stats(s1, q1, M, g1p, b1p)

    # BN1 apply + ReLU in f32, stored bf16 (halves the conv2 im2col traffic).
    a1 = jnp.maximum(y1[:M, :Cout].astype(jnp.float32) * scale1[:, :Cout]
                     + shift1[:, :Cout], 0.0).astype(jnp.bfloat16)
    a1 = a1.reshape(N, Ho, Wo, Cout)

    # conv2 patches (bf16)
    p2, _ = _im2col(a1, 3, 1, 1)
    p2 = _pad2d(p2, Mp, K2p)
    w2m = _pad2d(w2.reshape(9 * Cout, Cout), K2p, Cp).astype(jnp.bfloat16)

    if stride != 1 or Cin != Cout:
        # Projection shortcut: 1x1 strided conv stats are fused into the conv2
        # pass; the cheap 1x1 matmul is recomputed in the epilogue so the
        # projected shortcut never round-trips through HBM.
        ws_, gs, bs = params["ws"], params["gs"], params["bs"]
        xs = x[:, ::stride, ::stride, :].reshape(M, Cin)
        xs = _pad2d(xs, Mp, Cin_p).astype(jnp.bfloat16)
        wsm = _pad2d(ws_.reshape(Cin, Cout), Cin_p, Cp).astype(jnp.bfloat16)

        y2, s2, q2, ssum, sqsum = _conv_stats_proj(p2, w2m, xs, wsm, tm)
        scale2, shift2 = _finalize_stats(s2, q2, M, g2p, b2p)
        scale_s, shift_s = _finalize_stats(ssum, sqsum, M,
                                           _pad1d(gs, Cp), _pad1d(bs, Cp))
        out = _bn_add_relu_proj(y2, xs, wsm, scale2, shift2,
                                scale_s, shift_s, tm_epi)
    else:
        # Identity shortcut: bf16 pass-through, specialized epilogue (no affine).
        y2, s2, q2 = _conv_stats(p2, w2m, tm)
        scale2, shift2 = _finalize_stats(s2, q2, M, g2p, b2p)
        xid = _pad2d(x.reshape(M, Cin), Mp, Cp).astype(jnp.bfloat16)
        out = _bn_add_relu_identity(y2, xid, scale2, shift2, tm_epi)

    return out[:M, :Cout].reshape(N, Ho, Wo, Cout)


# ----------------------------- pure-JAX reference ------------------------------

def ref_forward(x, params, stride):
    def conv(a, w, s, pad):
        return jax.lax.conv_general_dilated(
            a, w, (s, s), pad, dimension_numbers=("NHWC", "HWIO", "NHWC"),
            precision=jax.lax.Precision.HIGHEST)

    def bn(y, g, b):
        mean = jnp.mean(y, axis=(0, 1, 2), keepdims=True)
        var = jnp.var(y, axis=(0, 1, 2), keepdims=True)
        return (y - mean) * jax.lax.rsqrt(var + EPS) * g + b

    out = jax.nn.relu(bn(conv(x, params["w1"], stride, ((1, 1), (1, 1))),
                         params["g1"], params["b1"]))
    out = bn(conv(out, params["w2"], 1, ((1, 1), (1, 1))),
             params["g2"], params["b2"])
    Cin, Cout = x.shape[-1], params["w1"].shape[-1]
    if stride != 1 or Cin != Cout:
        sc = bn(conv(x, params["ws"], stride, ((0, 0), (0, 0))),
                params["gs"], params["bs"])
    else:
        sc = x
    return jax.nn.relu(out + sc)


# ----------------------------------- main ---------------------------------------

def _make_params(key, cin, cout, projection):
    ks = jax.random.split(key, 9)
    p = {
        "w1": 0.1 * jax.random.normal(ks[0], (3, 3, cin, cout), jnp.float32),
        "g1": 1.0 + 0.1 * jax.random.normal(ks[1], (cout,), jnp.float32),
        "b1": 0.1 * jax.random.normal(ks[2], (cout,), jnp.float32),
        "w2": 0.1 * jax.random.normal(ks[3], (3, 3, cout, cout), jnp.float32),
        "g2": 1.0 + 0.1 * jax.random.normal(ks[4], (cout,), jnp.float32),
        "b2": 0.1 * jax.random.normal(ks[5], (cout,), jnp.float32),
    }
    if projection:
        p["ws"] = 0.1 * jax.random.normal(ks[6], (1, 1, cin, cout), jnp.float32)
        p["gs"] = 1.0 + 0.1 * jax.random.normal(ks[7], (cout,), jnp.float32)
        p["bs"] = 0.1 * jax.random.normal(ks[8], (cout,), jnp.float32)
    return p


if __name__ == "__main__":
    key = jax.random.PRNGKey(0)
    kx, kp1, kp2 = jax.random.split(key, 3)

    # NHWC input.
    x = jax.random.normal(kx, (2, 16, 16, 4), jnp.float32)

    # Case 1: projection shortcut (in=4, out=8, stride=2).
    # tm=96 deliberately forces multi-tile + M-padding paths at toy size.
    params = _make_params(kp1, 4, 8, projection=True)
    out = jax.block_until_ready(basic_block_forward(x, params, stride=2, tm=96))
    ref = ref_forward(x, params, stride=2)
    assert out.shape == (2, 8, 8, 8)
    assert jnp.allclose(out, ref, rtol=5e-2, atol=5e-2), (
        float(jnp.max(jnp.abs(out - ref))))

    # Case 2: identity shortcut (in=out=4, stride=1), default (single) tile.
    params_id = _make_params(kp2, 4, 4, projection=False)
    out_id = jax.block_until_ready(basic_block_forward(x, params_id, stride=1))
    ref_id = ref_forward(x, params_id, stride=1)
    assert out_id.shape == (2, 16, 16, 4)
    assert jnp.allclose(out_id, ref_id, rtol=5e-2, atol=5e-2), (
        float(jnp.max(jnp.abs(out_id - ref_id))))

    print("KERNEL_OK")
</pallas_src>

<mosaic_0001>
module attributes {stable_mosaic.version = 11 : i64} {
  func.func @conv_stats_kernel(%arg0: i32, %arg1: memref<96x128xbf16, #tpu.memory_space<vmem>>, %arg2: memref<128x128xbf16, #tpu.memory_space<vmem>>, %arg3: memref<96x128xbf16, #tpu.memory_space<vmem>>, %arg4: memref<8x128xf32, #tpu.memory_space<vmem>>, %arg5: memref<8x128xf32, #tpu.memory_space<vmem>>) attributes {dimension_semantics = [#tpu.dimension_semantics<parallel>], iteration_bounds = array<i64: 2>, scalar_prefetch = 0 : i64, scratch_operands = 0 : i64, tpu.core_type = #tpu.core_type<tc>, window_params = [{transform_indices = @transform_0, window_bounds = array<i64: 96, 128>}, {pipeline_mode = #tpu.pipeline_mode<synchronous>, transform_indices = @transform_1, window_bounds = array<i64: 128, 128>}, {transform_indices = @transform_2, window_bounds = array<i64: 96, 128>}, {transform_indices = @transform_3, window_bounds = array<i64: 8, 128>}, {transform_indices = @transform_4, window_bounds = array<i64: 8, 128>}]} {
    %c0 = arith.constant 0 : index
    %c0_0 = arith.constant 0 : index
    %0 = vector.load %arg1[%c0, %c0_0] : memref<96x128xbf16, #tpu.memory_space<vmem>>, vector<96x128xbf16>
    %c0_1 = arith.constant 0 : index
    %c0_2 = arith.constant 0 : index
    %1 = vector.load %arg2[%c0_1, %c0_2] : memref<128x128xbf16, #tpu.memory_space<vmem>>, vector<128x128xbf16>
    %cst = arith.constant dense<0.000000e+00> : vector<96x128xf32>
    %2 = tpu.matmul %0, %1, %cst {dimension_numbers = #tpu.dot_dimension_numbers<[1], [0], [0], [1], [0, 0, 1, 1], [], []>} : vector<96x128xbf16>, vector<128x128xbf16>, vector<96x128xf32> -> vector<96x128xf32>
    %3 = arith.truncf %2 : vector<96x128xf32> to vector<96x128xbf16>
    %c0_3 = arith.constant 0 : index
    %c0_4 = arith.constant 0 : index
    %4 = vector.load %arg3[%c0_3, %c0_4] : memref<96x128xbf16, #tpu.memory_space<vmem>>, vector<96x128xbf16>
    tpu.vector_store %arg3[%c0_3, %c0_4], %3 {strides = array<i32>} : memref<96x128xbf16, #tpu.memory_space<vmem>>, vector<96x128xbf16>,
    %5 = vector.shape_cast %2 : vector<96x128xf32> to vector<12x8x128xf32>
    %cst_5 = arith.constant dense<0.000000e+00> : vector<8x128xf32>
    %6 = vector.multi_reduction <add>, %5, %cst_5 [0] : vector<12x8x128xf32> to vector<8x128xf32>
    %c0_6 = arith.constant 0 : index
    %c0_7 = arith.constant 0 : index
    %7 = vector.load %arg4[%c0_6, %c0_7] : memref<8x128xf32, #tpu.memory_space<vmem>>, vector<8x128xf32>
    tpu.vector_store %arg4[%c0_6, %c0_7], %6 {strides = array<i32>} : memref<8x128xf32, #tpu.memory_space<vmem>>, vector<8x128xf32>,
    %8 = arith.mulf %5, %5 : vector<12x8x128xf32>
    %cst_8 = arith.constant dense<0.000000e+00> : vector<8x128xf32>
    %9 = vector.multi_reduction <add>, %8, %cst_8 [0] : vector<12x8x128xf32> to vector<8x128xf32>
    %c0_9 = arith.constant 0 : index
    %c0_10 = arith.constant 0 : index
    %10 = vector.load %arg5[%c0_9, %c0_10] : memref<8x128xf32, #tpu.memory_space<vmem>>, vector<8x128xf32>
    tpu.vector_store %arg5[%c0_9, %c0_10], %9 {strides = array<i32>} : memref<8x128xf32, #tpu.memory_space<vmem>>, vector<8x128xf32>,
    return
  }
  func.func @transform_0(%arg0: i32) -> (i32, i32) {
    %c0_i32 = arith.constant 0 : i32
    %c0_i32_0 = arith.constant 0 : i32
    return %arg0, %c0_i32 : i32, i32
  }
  func.func @transform_1(%arg0: i32) -> (i32, i32) {
    %c0_i32 = arith.constant 0 : i32
    %c0_i32_0 = arith.constant 0 : i32
    %c0_i32_1 = arith.constant 0 : i32
    return %c0_i32, %c0_i32_0 : i32, i32
  }
  func.func @transform_2(%arg0: i32) -> (i32, i32) {
    %c0_i32 = arith.constant 0 : i32
    %c0_i32_0 = arith.constant 0 : i32
    return %arg0, %c0_i32 : i32, i32
  }
  func.func @transform_3(%arg0: i32) -> (i32, i32) {
    %c0_i32 = arith.constant 0 : i32
    %c0_i32_0 = arith.constant 0 : i32
    return %arg0, %c0_i32 : i32, i32
  }
  func.func @transform_4(%arg0: i32) -> (i32, i32) {
    %c0_i32 = arith.constant 0 : i32
    %c0_i32_0 = arith.constant 0 : i32
    return %arg0, %c0_i32 : i32, i32
  }
}

</mosaic_0001>

<bundles_post_ra>
// kernel: tpu_custom_call.1
= control target key start
LH: loop header
LB: loop body
LE: loop exit
PB: predicated region body
PF: predicated region fallthrough
CT: control target
= control target key end

     0   :  { %10 = vsyncpa [#allocation3], 0  ;;  %s1332_s0 = inlined_call_operand.hbm [shape: bf16[192,128], index: 0, kind: input, shape index: {}]   ;;  %s1333_s1 = inlined_call_operand.hbm [shape: bf16[128,128], index: 1, kind: input, shape index: {}]   ;;  %s1334_s2 = inlined_call_operand.hbm [shape: bf16[192,128], index: 2, kind: output, shape index: {0}]   ;;  %s1335_s3 = inlined_call_operand.hbm [shape: f32[16,128], index: 3, kind: output, shape index: {1}]   ;;  %s1336_s4 = inlined_call_operand.hbm [shape: f32[16,128], index: 4, kind: output, shape index: {2}]  }
   0x1   :  { %12 = vsyncpa [#allocation3 + $0x1], 0 }
   0x2   :  { %13 = vsyncpa [#allocation6], 0 }
   0x3   :  { %14 = vsyncpa [#allocation4], 0 }
   0x4   :  { %16 = vsyncpa [#allocation4 + $0x1], 0 }
   0x5   :  { %17 = vsyncpa [#allocation9], 0 }
   0x6   :  { %19 = vsyncpa [#allocation9 + $0x1], 0  ;;  %s1108_s15 = smov 0   ;;  %s1110_s16 = smov 0  }
   0x7   :  { %s1112_s17 = smov 0   ;;  %s1114_s18 = smov 0  }
   0x8 LB: > { %s1129_s19 = sadd.s32 4294967295, %s1076_s18   ;;  %s1337_s20 = sadd.s32 4294967294, %s1076_s18   ;;  %s1076_s18 = sphi %s1114_s18, %s1353_s18   ;;  %s1072_s17 = sphi %s1112_s17, %s1352_s17   ;;  %s1068_s16 = sphi %s1110_s16, %s1351_s16   ;;  %s1064_s15 = sphi %s1108_s15, %s1350_s15  }
   0x9   : > { %p45_p0 = scmp.ne.s32.totalorder %s1068_s16, %s1064_s15  ;;  %p46_p1 = scmp.eq.s32.totalorder %s1129_s19, 0 }
   0xa   : > { %p90_p2 = scmp.eq.s32.totalorder %s1129_s19, 1  ;;  %p96_p3 = scmp.eq.s32.totalorder %s1337_s20, 1 }
   0xb   : > { %p1140_p4 = por %p46_p1, %p45_p0  ;;  %p667_p5 = scmp.ge.s32.totalorder %s1076_s18, 1 }
   0xc   : > { %p1145_p6 = por %p96_p3, %p45_p0  ;;  %p155_p7 = scmp.lt.s32.totalorder %s1076_s18, 3 }
   0xd   : > { %s166_s25 = sshll.u32 %s1333_s1, 4  ;;  %s1078_s27 = smov [#allocation5]   ;;  %s167_s25 = int_to_ptr.hbm [resolvable:$true] %s166_s25 }
   0xe   : > { %p1153_p8 = pnand %p667_p5, %p155_p7  ;;  %s168_s28 = sshll.u32 %s1078_s27, 4  ;;  %s169_s28 = int_to_ptr.vmem [resolvable:$true] %s168_s28 }
   0xf   : > { %s1163_s29 = sadd.s32 1, %s1076_s18   ;;  %s1338_s30 = smov 64  }
  0x10   : > { %p827_p9 = pneg %p1153_p8  ;;  %s1339_s5 = smov 4  }
  0x11   : > { %s29_s6 = ssub.s32 %s1076_s18, %s1163_s29  ;;  %s32_s7 = sadd.s32 1, %s1072_s17 }
  0x12   : > { %p828_p10 = pnand %p827_p9, %p46_p1  ;;  %p30_p12 = scmp.eq.s32.totalorder %s29_s6, 0 }
  0x13   : > { %p39_p13 = scmp.ne.s32.totalorder %s1072_s17, %s1068_s16  ;;  %p40_p0 = scmp.eq.s32.totalorder %s1076_s18, 0 }
  0x14   : > { %830 = dma.hbm_to_vmem [thread:$0]  (!%p828_p10), %s167_s25, 1024, %s169_s28, [#allocation6], %s1338_s30, %s1338_s30, %s1339_s5  }
  0x15   : > { %p846_p3 = scmp.lt.s32.totalorder %s1076_s18, 2  ;;  %p41_p5 = por %p40_p0, %p39_p13 }
  0x16   : > { %s1176_s8 = scalar_select %p30_p12, %s1072_s17, %s32_s7  }
  0x17   : > { %p1180_p7 = por %p90_p2, %p39_p13  ;;  %s182_s10 = sand.u32 1, %s1072_s17  }
  0x18   : > { %s738_s11 = smul.u32 48, %s1076_s18  ;;  %p1189_p9 = pnand %p846_p3, %p41_p5 }
  0x19   : > { %s813_s12 = smul.u32 48, %s182_s10  ;;  %s183_s6 = scalar_lea.sflag [#allocation3], %s182_s10 }
  0x1a   : > { %s191_s23 = scalar_lea.hbm %s1332_s0, %s738_s11  ;;  %p920_p10 = pneg %p1189_p9 }
  0x1b   : > { %s192_s25 = sshll.u32 %s191_s23, 4  ;;  %s186_s27 = scalar_lea.vmem [#allocation2], %s813_s12  ;;  %s193_s25 = int_to_ptr.hbm [resolvable:$true] %s192_s25 }
  0x1c   : > { %s194_s28 = sshll.u32 %s186_s27, 4  ;;  %s916_s7 = sshra.s32 %s193_s25, 4  ;;  %s195_s28 = int_to_ptr.vmem [resolvable:$true] %s194_s28  ;;  %s917_s7 = int_to_ptr.hbm [resolvable:$true] %s916_s7 }
  0x1d   : > { %s918_s20 = scalar_lea.hbm %s917_s7, 48  ;;  %s923_s14 = scalar_lea.hbm %s1332_s0, 96 }
  0x1e   : > { %p919_p2 = scmp.ne.s32.totalorder %s917_s7, %s918_s20  ;;  %p924_p0 = scmp.lt.s32.totalorder %s917_s7, %s1332_s0 }
  0x1f   : > { %p925_p3 = scmp.lt.s32.totalorder %s923_s14, %s918_s20 }
  0x20   : > { %p921_p12 = pnand %p920_p10, %p919_p2 }
  0x21   : > { %p926_p5 = por %p925_p3, %p924_p0 }
  0x22   : > { %p922_p13 = pneg %p921_p12 }
  0x24   : > { %p927_p11 = pnand %p926_p5, %p922_p13 }
  0x26   : > { %930 = shalt.err (!%p927_p11)
}
  0x27   : > { %s1345_s10 = smov 4   ;;  %s1346_s12 = smov 64  }
  0x28   : > { %834 = dma.hbm_to_vmem [thread:$0]  (!%p1189_p9), %s193_s25, 768, %s195_s28, %s183_s6, %s1346_s12, %s1346_s12, %s1345_s10  }
  0x29   : > { %206 = sbr.rel (%p1153_p8) target bundleno = 278 (0x116), region = 28  ;;  %s1209_s23 = sand.u32 (!%p1153_p8), 1, %s1068_s16  }
  0x2a   : > { %s814_s20 = smul.u32 (!%p1153_p8), 48, %s1209_s23  ;;  %s209_s30 = scalar_lea.sflag (!%p1153_p8), [#allocation3], %s1209_s23 }
  0x2c   : > { %s1215_s5 = scalar_lea.vmem (!%p1153_p8), [#allocation2], %s814_s20 }
  0x2e   : > { %1047 = dma.done.wait (%p1140_p4), %s209_s30, 768  }
  0x2f   : > { %1049 = vsyncadd (%p1140_p4), %s209_s30, 4294966528 }
  0x30   : > { %1051 = dma.done.wait (%p46_p1), [#allocation6], 1024  }
  0x31   : > { %1053 = vsyncadd (%p46_p1), [#allocation6], 4294966272  ;;  %v752_v0 = vld [vmem:[#allocation5 + $0x38] sm:$0xff]  ;;  %v751_v1 = vld [vmem:[#allocation5 + $0x30] sm:$0xff]  ;;  %s1233_s21 = scalar_lea.vmem [#allocation7], %s814_s20  ;;  %s753_s26 = smul.u32 48, %s1129_s19 }
  0x32   : > { %367 = vmatpush.bf16.msra.mxu0 %v752_v0  ;;  %790 = vmatpush.bf16.msra.mxu2 %v752_v0  ;;  %v750_v2 = vld [vmem:[#allocation5 + $0x28] sm:$0xff]  ;;  %v749_v3 = vld [vmem:[#allocation5 + $0x20] sm:$0xff]  ;;  %v748_v4 = vld [vmem:[#allocation5 + $0x18] sm:$0xff]  ;;  %s489_s24 = sshll.u32 %s1233_s21, 4  ;;  %s673_s6 = sshll.u32 %s1209_s23, 3  ;;  %s1245_s24 = int_to_ptr.vmem [resolvable:$true] %s489_s24 }
  0x33   : > { %791 = vmatpush.bf16.msra.mxu3 %v752_v0  ;;  %789 = vmatpush.bf16.msra.mxu1 %v752_v0  ;;  %v747_v5 = vld [vmem:[#allocation5 + $0x10] sm:$0xff]  ;;  %v746_v6 = vld [vmem:[#allocation5 + $0x8] sm:$0xff]  ;;  %v745_v7 = vld [vmem:[#allocation5] sm:$0xff]  ;;  %s488_s28 = scalar_lea.hbm %s1334_s2, %s753_s26  ;;  %s734_s11 = sshll.u32 %s1129_s19, 3 }
  0x34   : > { %v739_v8 = vld [vmem:[%s1215_s5] sm:$0xff]  ;;  %v741_v9 = vld [vmem:[%s1215_s5 + $0x10] sm:$0xff]  ;;  %v740_v11 = vld [vmem:[%s1215_s5 + $0x8] sm:$0xff]  ;;  %s491_s7 = sshll.u32 %s488_s28, 4  ;;  %s1254_s10 = scalar_lea.hbm %s1335_s3, %s734_s11  ;;  %s1248_s7 = int_to_ptr.hbm [resolvable:$true] %s491_s7 }
  0x35   : > { %v743_v10 = vld [vmem:[%s1215_s5 + $0x20] sm:$0xff]  ;;  %v742_v12 = vld [vmem:[%s1215_s5 + $0x18] sm:$0xff]  ;;  %v744_v13 = vld [vmem:[%s1215_s5 + $0x28] sm:$0xff]  ;;  %s1261_s5 = scalar_lea.hbm %s1336_s4, %s734_s11  ;;  %s467_s26 = scalar_lea.sflag [#allocation4], %s1209_s23 }
  0x36   : > { %368 = vmatpush.bf16.msra.mxu0 %v751_v1  ;;  %793 = vmatpush.bf16.msra.mxu2 %v751_v1  ;;  %s960_s25 = sshra.s32 %s1248_s7, 4  ;;  %s961_s25 = int_to_ptr.hbm [resolvable:$true] %s960_s25 }
  0x37   : > { %794 = vmatpush.bf16.msra.mxu3 %v751_v1  ;;  %792 = vmatpush.bf16.msra.mxu1 %v751_v1  ;;  %s962_s27 = scalar_lea.hbm %s961_s25, 48  ;;  %p967_p11 = scmp.lt.s32.totalorder %s961_s25, %s1334_s2 }
  0x38   : > { %p963_p1 = scmp.ne.s32.totalorder %s961_s25, %s962_s27 }
  0x3a   : > { %369 = vmatpush.bf16.msra.mxu0 %v750_v2  ;;  %796 = vmatpush.bf16.msra.mxu2 %v750_v2  ;;  %p964_p4 = pnand %p963_p1, %p1180_p7 }
  0x3b   : > { %797 = vmatpush.bf16.msra.mxu3 %v750_v2  ;;  %795 = vmatpush.bf16.msra.mxu1 %v750_v2 }
  0x3c   : > { %p965_p8 = pneg %p964_p4 }
  0x3e   : > { %370 = vmatpush.bf16.msra.mxu0 %v749_v3  ;;  %799 = vmatpush.bf16.msra.mxu2 %v749_v3 }
  0x3f   : > { %800 = vmatpush.bf16.msra.mxu3 %v749_v3  ;;  %798 = vmatpush.bf16.msra.mxu1 %v749_v3 }
  0x42   : > { %371 = vmatpush.bf16.msra.mxu0 %v748_v4  ;;  %802 = vmatpush.bf16.msra.mxu2 %v748_v4 }
  0x43   : > { %803 = vmatpush.bf16.msra.mxu3 %v748_v4  ;;  %801 = vmatpush.bf16.msra.mxu1 %v748_v4 }
  0x46   : > { %372 = vmatpush.bf16.msra.mxu0 %v747_v5  ;;  %805 = vmatpush.bf16.msra.mxu2 %v747_v5 }
  0x47   : > { %806 = vmatpush.bf16.msra.mxu3 %v747_v5  ;;  %804 = vmatpush.bf16.msra.mxu1 %v747_v5 }
  0x4a   : > { %373 = vmatpush.bf16.msra.mxu0 %v746_v6  ;;  %808 = vmatpush.bf16.msra.mxu2 %v746_v6 }
  0x4b   : > { %809 = vmatpush.bf16.msra.mxu3 %v746_v6  ;;  %807 = vmatpush.bf16.msra.mxu1 %v746_v6 }
  0x4e   : > { %374 = vmatpush.bf16.msra.mxu0 %v745_v7  ;;  %811 = vmatpush.bf16.msra.mxu2 %v745_v7 }
  0x4f   : > { %812 = vmatpush.bf16.msra.mxu3 %v745_v7  ;;  %810 = vmatpush.bf16.msra.mxu1 %v745_v7 }
  0x51   : > { %375 = vmatmul.bf16.vlgmr.msra.gmra.mxu0 %v739_v8  ;;  %385 = vmatmul.bf16.vlgmr.msra.gmra.mxu2 %v741_v9 }
  0x52   : > { %395 = vmatmul.bf16.vlgmr.msra.gmra.mxu3 %v743_v10  ;;  %380 = vmatmul.bf16.vlgmr.msra.gmra.mxu1 %v740_v11 }
  0x61   : > { %390 = vmatmul.bf16.gmra.mxu2 %v742_v12 }
  0x62   : > { %400 = vmatmul.bf16.gmra.mxu3 %v744_v13 }
  0xce   : > { %v376_v14 = vpop.f32.mrf.mxu0 }
  0xcf   : > { %v381_v15 = vpop.f32.mrf.mxu1  ;;  %v442_v19 = vmul.f32 %v376_v14, %v376_v14 }
  0xd0   : > { %v444_v25 = vmul.f32 %v381_v15, %v381_v15 }
  0xd4   : > { %v386_v16 = vpop.f32.mrf.mxu2 }
  0xd5   : > { %v396_v17 = vpop.f32.mrf.mxu3  ;;  %v446_v37 = vmul.f32 %v386_v16, %v386_v16 }
  0xd6   : > { %v378_v18 = vpop.f32.mrf.mxu0  ;;  %v450_v53 = vmul.f32 %v396_v17, %v396_v17 }
  0xd7   : > { %v757_v20 = vpack.c.bf16 %v378_v18, %v376_v14  ;;  %v443_v21 = vmul.f32 %v378_v18, %v378_v18  ;;  %v383_v22 = vpop.f32.mrf.mxu1  ;;  %v430_v24 = vadd.f32 %v378_v18, %v376_v14 }
  0xd8   : > { %v762_v23 = vpack.c.bf16 %v383_v22, %v381_v15  ;;  %v445_v32 = vmul.f32 %v383_v22, %v383_v22 }
  0xd9   : > { %758 = vst [vmem:[%s1233_s21] sm:$0xff] %v757_v20   ;;  %v454_v26 = vadd.f32 %v443_v21, %v442_v19  ;;  %v431_v28 = vadd.f32 %v430_v24, %v381_v15 }
  0xda   : > { %784 = vst [vmem:[%s1233_s21 + $0x8] sm:$0xff] %v762_v23  }
  0xdb   : > { %v455_v33 = vadd.f32 %v454_v26, %v444_v25  ;;  %v432_v34 = vadd.f32 %v431_v28, %v383_v22 }
  0xdc   : > { %v388_v27 = vpop.f32.mrf.mxu2 }
  0xdd   : > { %v767_v29 = vpack.c.bf16 %v388_v27, %v386_v16  ;;  %v398_v30 = vpop.f32.mrf.mxu3  ;;  %v456_v35 = vadd.f32 %v455_v33, %v445_v32  ;;  %v433_v38 = vadd.f32 %v432_v34, %v386_v16  ;;  %v447_v42 = vmul.f32 %v388_v27, %v388_v27 }
  0xde   : > { %v777_v31 = vpack.c.bf16 %v398_v30, %v396_v17  ;;  %v451_v56 = vmul.f32 %v398_v30, %v398_v30 }
  0xdf   : > { %785 = vst [vmem:[%s1233_s21 + $0x10] sm:$0xff] %v767_v29   ;;  %v457_v40 = vadd.f32 %v456_v35, %v446_v37  ;;  %v434_v41 = vadd.f32 %v433_v38, %v388_v27 }
  0xe0   : > { %787 = vst [vmem:[%s1233_s21 + $0x20] sm:$0xff] %v777_v31  }
  0xe1   : > { %v458_v44 = vadd.f32 %v457_v40, %v447_v42 }
  0xe4   : > { %v391_v36 = vpop.f32.mrf.mxu2 }
  0xe5   : > { %v401_v39 = vpop.f32.mrf.mxu3  ;;  %v448_v43 = vmul.f32 %v391_v36, %v391_v36  ;;  %v435_v45 = vadd.f32 %v434_v41, %v391_v36 }
  0xe7   : > { %v459_v47 = vadd.f32 %v458_v44, %v448_v43 }
  0xec   : > { %v393_v46 = vpop.f32.mrf.mxu2 }
  0xed   : > { %v772_v48 = vpack.c.bf16 %v393_v46, %v391_v36  ;;  %v436_v49 = vadd.f32 %v435_v45, %v393_v46  ;;  %v449_v50 = vmul.f32 %v393_v46, %v393_v46  ;;  %v403_v51 = vpop.f32.mrf.mxu3 }
  0xee   : > { %v782_v52 = vpack.c.bf16 %v403_v51, %v401_v39 }
  0xef   : > { %786 = vst [vmem:[%s1233_s21 + $0x18] sm:$0xff] %v772_v48   ;;  %v437_v54 = vadd.f32 %v436_v49, %v396_v17  ;;  %v460_v55 = vadd.f32 %v459_v47, %v449_v50 }
  0xf0   : > { %788 = vst [vmem:[%s1233_s21 + $0x28] sm:$0xff] %v782_v52   ;;  %s966_s21 = scalar_lea.hbm %s1334_s2, 96 }
  0xf1   : > { %v461_v57 = vadd.f32 %v460_v55, %v450_v53  ;;  %v438_v58 = vadd.f32 %v437_v54, %v398_v30  ;;  %p968_p9 = scmp.lt.s32.totalorder %s966_s21, %s962_s27 }
  0xf3   : > { %p969_p2 = por %p968_p9, %p967_p11 }
  0xf5   : > { %p970_p10 = pnand %p969_p2, %p965_p8 }
  0xf7   : > { %973 = shalt.err (!%p970_p10)
}
  0xf8   : > { %s1081_s11 = smov 64   ;;  %s1082_s20 = smov 4   ;;  %v452_v59 = vmul.f32 %v401_v39, %v401_v39  ;;  %v439_v60 = vadd.f32 %v438_v58, %v401_v39  ;;  %v462_v61 = vadd.f32 %v461_v57, %v451_v56  ;;  %v453_v63 = vmul.f32 %v403_v51, %v403_v51 }
  0xf9   : > { %821 = dma.vmem_to_hbm [thread:$0]  (%p1180_p7), %s1245_s24, 768, %s1248_s7, %s467_s26, %s1081_s11, %s1081_s11, %s1082_s20  }
  0xfa   : > { %s245_s30 = scalar_lea.vmem [#allocation8], %s673_s6  ;;  %s508_s12 = sshll.u32 %s1254_s10, 4  ;;  %v440_v62 = vadd.f32 %v439_v60, %v403_v51  ;;  %v463_v0 = vadd.f32 %v462_v61, %v452_v59  ;;  %s509_s12 = int_to_ptr.hbm [resolvable:$true] %s508_s12 }
  0xfb   : > { %s506_s28 = sshll.u32 %s245_s30, 4  ;;  %s522_s25 = sshll.u32 %s1261_s5, 4  ;;  %s507_s28 = int_to_ptr.vmem [resolvable:$true] %s506_s28  ;;  %s1285_s25 = int_to_ptr.hbm [resolvable:$true] %s522_s25 }
  0xfc   : > { %s252_s27 = scalar_lea.vmem [#allocation10], %s673_s6  ;;  %v464_v1 = vadd.f32 %v463_v0, %v453_v63  ;;  %441 = vst [vmem:[%s245_s30] sm:$0xff] %v440_v62  ;;  %s1347_s24 = sand.u32 1, %s1129_s19  }
  0xfd   : > { %s520_s13 = sshll.u32 %s252_s27, 4  ;;  %s472_s7 = scalar_lea.sflag [#allocation9], %s1347_s24  ;;  %s1283_s13 = int_to_ptr.vmem [resolvable:$true] %s520_s13 }
  0xfe   : > { %s988_s10 = sshra.s32 %s509_s12, 4  ;;  %s994_s26 = scalar_lea.hbm %s1335_s3, 16  ;;  %s989_s10 = int_to_ptr.hbm [resolvable:$true] %s988_s10 }
  0xff   : > { %s990_s5 = scalar_lea.hbm %s989_s10, 8  ;;  %p995_p3 = scmp.lt.s32.totalorder %s989_s10, %s1335_s3 }
 0x100   : > { %p991_p12 = scmp.ne.s32.totalorder %s989_s10, %s990_s5  ;;  %p996_p5 = scmp.lt.s32.totalorder %s994_s26, %s990_s5 }
 0x102   : > { %p992_p13 = pnand %p991_p12, %p1180_p7  ;;  %p997_p1 = por %p996_p5, %p995_p3 }
 0x104   : > { %p993_p0 = pneg %p992_p13 }
 0x106   : > { %p998_p4 = pnand %p997_p1, %p993_p0 }
 0x108   : > { %1001 = shalt.err (!%p998_p4)
}
 0x109   : > { %822 = dma.vmem_to_hbm [thread:$0]  (%p1180_p7), %s507_s28, 128, %s509_s12, %s472_s7   ;;  %465 = vst [vmem:[%s252_s27] sm:$0xff] %v464_v1 }
 0x10a   : > { %s1016_s19 = sshra.s32 %s1285_s25, 4  ;;  %s1022_s24 = scalar_lea.hbm %s1336_s4, 16  ;;  %s1017_s19 = int_to_ptr.hbm [resolvable:$true] %s1016_s19 }
 0x10b   : > { %s1018_s11 = scalar_lea.hbm %s1017_s19, 8  ;;  %p1023_p2 = scmp.lt.s32.totalorder %s1017_s19, %s1336_s4 }
 0x10c   : > { %p1019_p8 = scmp.ne.s32.totalorder %s1017_s19, %s1018_s11  ;;  %p1024_p10 = scmp.lt.s32.totalorder %s1022_s24, %s1018_s11 }
 0x10e   : > { %p1020_p11 = pnand %p1019_p8, %p1180_p7  ;;  %p1025_p12 = por %p1024_p10, %p1023_p2 }
 0x110   : > { %p1021_p9 = pneg %p1020_p11 }
 0x112   : > { %p1026_p13 = pnand %p1025_p12, %p1021_p9 }
 0x114   : > { %1029 = shalt.err (!%p1026_p13)
}
 0x115   : > { %823 = dma.vmem_to_hbm [thread:$0]  (%p1180_p7), %s1283_s13, 128, %s1285_s25, %s472_s7  }
 0x116 PF: > { %s534_s28 = sand.u32 1, %s1064_s15   ;;  %p1348_p0 = scmp.ge.s32.totalorder %s1076_s18, 2 }
 0x117   : > { %s535_s12 = scalar_lea.sflag [#allocation4], %s534_s28 }
 0x118   : > { %p836_p3 = pnand %p1348_p0, %p1145_p6 }
 0x11a   : > { %p837_p5 = pneg %p836_p3 }
 0x11c   : > { %1055 = dma.done.wait (%p837_p5), %s535_s12, 768  }
 0x11d   : > { %1057 = vsyncadd (%p837_p5), %s535_s12, 4294966528  ;;  %s1349_s27 = sadd.s32 4294967294, %s1076_s18  }
 0x11e   : > { %s544_s23 = sand.u32 1, %s1349_s27  }
 0x11f   : > { %s545_s6 = scalar_lea.sflag [#allocation9], %s544_s23 }
 0x120   : > { %1059 = dma.done.wait (%p837_p5), %s545_s6, 256  }
 0x121   : > { %1061 = vsyncadd (%p837_p5), %s545_s6, 4294967040  ;;  %p22_p7 = scmp.ge.s32.totalorder %s1163_s29, 4   ;;  %s1350_s15 = smov %s1068_s16 }
 0x122   : > { %s1351_s16 = smov %s1072_s17  ;;  %s1352_s17 = smov %s1176_s8 }
 0x123   : > { %s1353_s18 = smov %s1163_s29  ;;  %24 = sbr.rel (!%p22_p7) target bundleno = 8 (0x8), region = 109 }
 0x128   :  { %561 = vsyncpa [#allocation3], 1 }
 0x129   :  { %563 = vsyncpa [#allocation3 + $0x1], 1 }
 0x12a   :  { %564 = vsyncpa [#allocation6], 1 }
 0x12b   :  { %565 = vsyncpa [#allocation4], 1 }
 0x12c   :  { %567 = vsyncpa [#allocation4 + $0x1], 1 }
 0x12d   :  { %568 = vsyncpa [#allocation9], 1 }
 0x12e   :  { %570 = vsyncpa [#allocation9 + $0x1], 1 }

</bundles_post_ra>
